<compile_context>
chip_gen: v7x
topology: tpu7x:2x2x1
jax: 0.10.0
libtpu: 0.0.40
codegen_flags: <defaults>
</compile_context>

<pallas_src>
import jax
import jax.numpy as jnp
import numpy as np
from jax import lax
from jax.experimental import pallas as pl
from jax.experimental.pallas import tpu as pltpu


_VMEM_LIMIT = 32 * 1024 * 1024          # explicit scoped-VMEM limit (safe on v5e/v6e/v7x)
_CONV_BLOCK_BUDGET = 4 * 1024 * 1024    # target bytes for the conv input row block
_POOL_BLOCK_BUDGET = 8 * 1024 * 1024    # target bytes for the pool input row block


def _pick_tile(total, cap):
    """Pick a row-tile size <= cap.

    Prefers an exact divisor of `total` (no ragged final block) unless the
    best divisor wastes more than 2x relative to the cap, in which case the
    final block is ragged (its OOB reads feed only discarded OOB output rows,
    and OOB writes are dropped).  Returns (tile, num_tiles).
    """
    cap = int(max(1, min(cap, total)))
    div = 1
    for d in range(cap, 0, -1):
        if total % d == 0:
            div = d
            break
    if 2 * div >= cap:
        return div, total // div
    return cap, int(pl.cdiv(total, cap))


# ---------------------------------------------------------------------------
# Kernels
# ---------------------------------------------------------------------------
def _conv3x3s2_kernel(main_ref, halo_ref, w01_ref, w2_ref, b_ref, o_ref):
    """3x3 stride-2 conv (bottom/right zero pad) on one (batch, row-tile) block.

    main_ref : (1, 2*tho, Wf, 2*Cin)  pair-folded padded rows [2*j*tho, 2*(j+1)*tho)
    halo_ref : (1, 1,     Wf, 2*Cin)  pair-folded padded row   2*(j+1)*tho
    w01_ref  : (3, 2*Cin, Cout)       kw=0/1 taps stacked along K  (VMEM resident)
    w2_ref   : (3, Cin, Cout)         kw=2 tap                     (VMEM resident)
    b_ref    : (1, Cout)              f32 bias                     (VMEM resident)
    o_ref    : (1, tho, Wo, Cout)
    """
    _, tho, wo, cout = o_ref.shape
    cin2 = main_ref.shape[-1]
    cin = cin2 // 2
    wf = main_ref.shape[2]
    m = tho * wo

    # Split rows into (output row, parity); reshapes keep the lane dim intact.
    main = main_ref[...].reshape(tho, 2, wf, cin2)
    halo = halo_ref[...].reshape(1, wf, cin2)
    r0 = main[:, 0]                                   # padded rows 2*ho
    r1 = main[:, 1]                                   # padded rows 2*ho + 1
    if tho == 1:
        r2 = halo                                     # padded row  2*ho + 2
    else:
        r2 = jnp.concatenate([main[1:, 0], halo], axis=0)

    acc = jnp.zeros((m, cout), jnp.float32)
    for kh, r in enumerate((r0, r1, r2)):             # r: (tho, Wf, 2*Cin)
        # kw=0/1: folded column wo holds x[2*ho+kh, 2*wo+{0,1}] -> one K=2*Cin dot.
        pair = r[:, :wo, :].reshape(m, cin2)
        acc = acc + jnp.dot(pair, w01_ref[kh],
                            preferred_element_type=jnp.float32)
        # kw=2: folded column wo+1, first Cin lanes hold x[2*ho+kh, 2*wo+2].
        tap2 = r[:, 1:, :cin].reshape(m, cin)
        acc = acc + jnp.dot(tap2, w2_ref[kh],
                            preferred_element_type=jnp.float32)

    out = acc + b_ref[...]                            # f32 bias add
    o_ref[...] = out.reshape(1, tho, wo, cout).astype(o_ref.dtype)


def _avgpool2_folded_kernel(x_ref, o_ref):
    """2x2 stride-2 mean; horizontal pairs pre-folded into lanes (W even)."""
    _, tho, wo, c = o_ref.shape
    x = x_ref[...].reshape(tho, 2, wo, 2 * c).astype(jnp.float32)
    top = x[:, 0]
    bot = x[:, 1]
    s = top[..., :c] + top[..., c:] + bot[..., :c] + bot[..., c:]
    o_ref[...] = (s * 0.25).reshape(1, tho, wo, c).astype(o_ref.dtype)


def _avgpool2_kernel(x_ref, o_ref):
    """2x2 stride-2 mean on an NHWC block (generic / odd-W fallback)."""
    _, tho, wo, c = o_ref.shape
    x = x_ref[...].astype(jnp.float32)                # (1, 2*tho, W, C)
    a = x[:, 0:2 * tho:2, 0:2 * wo:2, :]
    b = x[:, 0:2 * tho:2, 1:2 * wo:2, :]
    cc = x[:, 1:2 * tho:2, 0:2 * wo:2, :]
    d = x[:, 1:2 * tho:2, 1:2 * wo:2, :]
    o_ref[...] = ((a + b + cc + d) * 0.25).astype(o_ref.dtype)


# ---------------------------------------------------------------------------
# Wrappers
# ---------------------------------------------------------------------------
def _conv_nhwc(x, weight, bias, compute_dtype):
    N, H, W, C = x.shape
    Cout, Cin, KH, KW = weight.shape
    if (KH, KW) != (3, 3):
        raise ValueError("DownSample conv must be 3x3")
    if Cin != C:
        raise ValueError(f"conv weight expects {Cin} input channels, got {C}")
    out_dtype = x.dtype

    Hp = H + 1                                  # F.pad(x, (0,1,0,1)): +1 bottom row
    Ho = (Hp - 3) // 2 + 1
    Wo = (W + 1 - 3) // 2 + 1
    Wf = Wo + 1                                 # folded (column-pair) width
    pad_w = 2 * Wf - W                          # >= 1; column W is the F.pad zero column

    # Pad bottom/right and fold horizontal pairs into lanes:
    # (N, Hp, 2*Wf, C) -> (N, Hp, Wf, 2*C); contiguous, fused with cast+pad by XLA.
    xf = jnp.pad(x.astype(compute_dtype),
                 ((0, 0), (0, 1), (0, pad_w), (0, 0))).reshape(N, Hp, Wf, 2 * C)

    # Weights: OIHW -> (KH, KW, Cin, Cout); kw=0/1 stacked along K host-side.
    wt = jnp.transpose(weight, (2, 3, 1, 0)).astype(compute_dtype)
    w01 = wt[:, 0:2].reshape(3, 2 * Cin, Cout)
    w2 = wt[:, 2]
    if bias is None:
        bias = jnp.zeros((Cout,), jnp.float32)
    b = bias.reshape(1, Cout).astype(jnp.float32)

    # Row-tile size: as many output rows per step as the VMEM budget allows
    # (big M for the MXU, few pipeline steps); keep >= 2 parallel chunks so
    # v7x's two TensorCores both get work even when N == 1.
    itemsize = jnp.dtype(compute_dtype).itemsize
    bytes_per_out_row = 2 * Wf * 2 * C * itemsize
    tho, n_tiles = _pick_tile(Ho, _CONV_BLOCK_BUDGET // max(bytes_per_out_row, 1))
    if N * n_tiles < 2 and Ho >= 2:
        tho, n_tiles = _pick_tile(Ho, (Ho + 1) // 2)

    out = pl.pallas_call(
        _conv3x3s2_kernel,
        out_shape=jax.ShapeDtypeStruct((N, Ho, Wo, Cout), out_dtype),
        grid=(N, n_tiles),
        in_specs=[
            # 2*tho padded rows of this tile.
            pl.BlockSpec((1, 2 * tho, Wf, 2 * C), lambda n, j: (n, j, 0, 0)),
            # One bottom halo row (padded row 2*(j+1)*tho); clamped so a ragged
            # final tile never yields an out-of-bounds 1-row block (its only
            # consumer rows are discarded anyway).
            pl.BlockSpec((1, 1, Wf, 2 * C),
                         lambda n, j: (n, jnp.minimum((j + 1) * 2 * tho, Hp - 1), 0, 0)),
            # Weights / bias stay resident in VMEM across the whole grid.
            pl.BlockSpec((3, 2 * Cin, Cout), lambda n, j: (0, 0, 0)),
            pl.BlockSpec((3, Cin, Cout), lambda n, j: (0, 0, 0)),
            pl.BlockSpec((1, Cout), lambda n, j: (0, 0)),
        ],
        out_specs=pl.BlockSpec((1, tho, Wo, Cout), lambda n, j: (n, j, 0, 0)),
        compiler_params=pltpu.CompilerParams(
            dimension_semantics=("parallel", "parallel"),
            vmem_limit_bytes=_VMEM_LIMIT),
    )(xf, xf, w01, w2, b)
    return out


def _pool_nhwc(x, compute_dtype):
    N, H, W, C = x.shape
    out_dtype = x.dtype
    Ho, Wo = H // 2, W // 2
    if Ho < 1 or Wo < 1:
        raise ValueError("avg_pool2d(k=2, s=2) needs H >= 2 and W >= 2")
    xc = x.astype(compute_dtype)
    itemsize = jnp.dtype(compute_dtype).itemsize

    if W % 2 == 0:
        # Horizontal pairs folded into lanes (free contiguous reshape): the two
        # W taps become lane slices instead of stride-2 sublane gathers.
        xin = xc.reshape(N, H, Wo, 2 * C)
        kernel, blk_w, blk_c = _avgpool2_folded_kernel, Wo, 2 * C
    else:
        # Odd W: avg_pool2d drops the last column; keep the generic strided kernel.
        xin = xc
        kernel, blk_w, blk_c = _avgpool2_kernel, W, C

    bytes_per_out_row = 2 * blk_w * blk_c * itemsize
    tho, n_tiles = _pick_tile(Ho, _POOL_BLOCK_BUDGET // max(bytes_per_out_row, 1))
    if N * n_tiles < 2 and Ho >= 2:
        tho, n_tiles = _pick_tile(Ho, (Ho + 1) // 2)

    return pl.pallas_call(
        kernel,
        out_shape=jax.ShapeDtypeStruct((N, Ho, Wo, C), out_dtype),
        grid=(N, n_tiles),
        in_specs=[pl.BlockSpec((1, 2 * tho, blk_w, blk_c),
                               lambda n, j: (n, j, 0, 0))],
        out_specs=pl.BlockSpec((1, tho, Wo, C), lambda n, j: (n, j, 0, 0)),
        compiler_params=pltpu.CompilerParams(
            dimension_semantics=("parallel", "parallel"),
            vmem_limit_bytes=_VMEM_LIMIT),
    )(xin)


def downsample_nhwc(x, *, with_conv, weight=None, bias=None, compute_dtype=None):
    """DownSample.forward on NHWC input (preferred entry point: no transposes).

    compute_dtype: dtype for the streamed activations / conv weights (e.g.
    jnp.bfloat16 to halve HBM traffic and roughly double MXU throughput);
    accumulation, bias add and the output dtype stay f32 / x.dtype.
    """
    if compute_dtype is None:
        compute_dtype = x.dtype
    if with_conv:
        if weight is None:
            raise ValueError("with_conv=True requires conv weights")
        return _conv_nhwc(x, weight, bias, compute_dtype)
    return _pool_nhwc(x, compute_dtype)


def downsample(x_nchw, *, with_conv, weight=None, bias=None, compute_dtype=None):
    """NCHW wrapper matching the PyTorch module interface.

    x_nchw: (N, C, H, W); weight: (Cout, Cin, 3, 3) OIHW; bias: (Cout,).
    """
    # TODO(synk): prefer downsample_nhwc end-to-end; these two transposes are
    # full extra HBM passes kept only for PyTorch NCHW interface parity.
    x = jnp.transpose(x_nchw, (0, 2, 3, 1))
    out = downsample_nhwc(x, with_conv=with_conv, weight=weight, bias=bias,
                          compute_dtype=compute_dtype)
    return jnp.transpose(out, (0, 3, 1, 2))


# ---------------------------------------------------------------------------
# Self-test
# ---------------------------------------------------------------------------
if __name__ == "__main__":
    key = jax.random.PRNGKey(0)
    kx, kw_, kb, kx2, kw2_, kb2, kx3 = jax.random.split(key, 7)

    def conv_ref(xq, wq, bq):
        xq = jnp.pad(xq, ((0, 0), (0, 0), (0, 1), (0, 1)))
        y = lax.conv_general_dilated(xq, wq, (2, 2), "VALID",
                                     dimension_numbers=("NCHW", "OIHW", "NCHW"))
        return y + bq[None, :, None, None]

    # --- small NCHW case matching the module defaults -----------------------
    N, C, H, W = 2, 4, 16, 16
    x = jax.random.normal(kx, (N, C, H, W), dtype=jnp.float32)
    fan_in = C * 9
    bound = 1.0 / np.sqrt(fan_in)
    weight = jax.random.uniform(kw_, (C, C, 3, 3), jnp.float32, -bound, bound)
    bias = jax.random.uniform(kb, (C,), jnp.float32, -bound, bound)

    # with_conv=True, f32 end-to-end
    y = jax.block_until_ready(downsample(x, with_conv=True, weight=weight, bias=bias))
    np.testing.assert_allclose(np.asarray(y), np.asarray(conv_ref(x, weight, bias)),
                               rtol=1e-4, atol=1e-4)
    assert y.shape == (N, C, 8, 8)

    # with_conv=True, bf16 streamed activations/weights (f32 accumulation)
    y_bf = jax.block_until_ready(
        downsample(x, with_conv=True, weight=weight, bias=bias,
                   compute_dtype=jnp.bfloat16))
    np.testing.assert_allclose(np.asarray(y_bf), np.asarray(conv_ref(x, weight, bias)),
                               rtol=5e-2, atol=5e-2)

    # with_conv=False (avg_pool2d k=2 s=2), even H/W -> lane-folded kernel
    y_pool = jax.block_until_ready(downsample(x, with_conv=False))
    ref_pool = x.reshape(N, C, H // 2, 2, W // 2, 2).mean(axis=(3, 5))
    np.testing.assert_allclose(np.asarray(y_pool), np.asarray(ref_pool),
                               rtol=1e-4, atol=1e-4)
    assert y_pool.shape == (N, C, 8, 8)

    # --- lane-dense (C = 128) sanity check for both paths -------------------
    N2, C2, H2, W2 = 1, 128, 8, 8
    x2 = jax.random.normal(kx2, (N2, C2, H2, W2), dtype=jnp.float32)
    bound2 = 1.0 / np.sqrt(C2 * 9)
    weight2 = jax.random.uniform(kw2_, (C2, C2, 3, 3), jnp.float32, -bound2, bound2)
    bias2 = jax.random.uniform(kb2, (C2,), jnp.float32, -bound2, bound2)

    y2 = jax.block_until_ready(
        downsample(x2, with_conv=True, weight=weight2, bias=bias2))
    np.testing.assert_allclose(np.asarray(y2), np.asarray(conv_ref(x2, weight2, bias2)),
                               rtol=5e-3, atol=5e-3)
    assert y2.shape == (N2, C2, 4, 4)

    y2p = jax.block_until_ready(downsample(x2, with_conv=False))
    ref2p = x2.reshape(N2, C2, H2 // 2, 2, W2 // 2, 2).mean(axis=(3, 5))
    np.testing.assert_allclose(np.asarray(y2p), np.asarray(ref2p),
                               rtol=1e-4, atol=1e-4)

    # --- odd spatial dims exercise the generic pooling kernel ---------------
    x3 = jax.random.normal(kx3, (1, 3, 7, 9), dtype=jnp.float32)
    y3 = jax.block_until_ready(downsample(x3, with_conv=False))
    Ho3, Wo3 = 3, 4
    ref3 = 0.25 * (x3[:, :, 0:2 * Ho3:2, 0:2 * Wo3:2]
                   + x3[:, :, 0:2 * Ho3:2, 1:2 * Wo3:2]
                   + x3[:, :, 1:2 * Ho3:2, 0:2 * Wo3:2]
                   + x3[:, :, 1:2 * Ho3:2, 1:2 * Wo3:2])
    np.testing.assert_allclose(np.asarray(y3), np.asarray(ref3), rtol=1e-4, atol=1e-4)
    assert y3.shape == (1, 3, 3, 4)

    print("KERNEL_OK")
</pallas_src>

<mosaic_0001>
module attributes {stable_mosaic.version = 11 : i64} {
  func.func @_conv3x3s2_kernel(%arg0: i32, %arg1: i32, %arg2: memref<1x16x9x8xf32, #tpu.memory_space<vmem>>, %arg3: memref<1x1x9x8xf32, #tpu.memory_space<vmem>>, %arg4: memref<3x8x4xf32, #tpu.memory_space<vmem>>, %arg5: memref<3x4x4xf32, #tpu.memory_space<vmem>>, %arg6: memref<1x4xf32, #tpu.memory_space<vmem>>, %arg7: memref<1x8x8x4xf32, #tpu.memory_space<vmem>>) attributes {dimension_semantics = [#tpu.dimension_semantics<parallel>, #tpu.dimension_semantics<parallel>], iteration_bounds = array<i64: 2, 1>, scalar_prefetch = 0 : i64, scratch_operands = 0 : i64, tpu.core_type = #tpu.core_type<tc>, window_params = [{transform_indices = @transform_0, window_bounds = array<i64: 1, 16, 9, 8>}, {transform_indices = @transform_1, window_bounds = array<i64: 1, 1, 9, 8>}, {pipeline_mode = #tpu.pipeline_mode<synchronous>, transform_indices = @transform_2, window_bounds = array<i64: 3, 8, 4>}, {pipeline_mode = #tpu.pipeline_mode<synchronous>, transform_indices = @transform_3, window_bounds = array<i64: 3, 4, 4>}, {pipeline_mode = #tpu.pipeline_mode<synchronous>, transform_indices = @transform_4, window_bounds = array<i64: 1, 4>}, {transform_indices = @transform_5, window_bounds = array<i64: 1, 8, 8, 4>}]} {
    %c0 = arith.constant 0 : index
    %c0_0 = arith.constant 0 : index
    %c0_1 = arith.constant 0 : index
    %c0_2 = arith.constant 0 : index
    %0 = vector.load %arg2[%c0, %c0_0, %c0_1, %c0_2] : memref<1x16x9x8xf32, #tpu.memory_space<vmem>>, vector<1x16x9x8xf32>
    %1 = vector.shape_cast %0 : vector<1x16x9x8xf32> to vector<8x2x9x8xf32>
    %c0_3 = arith.constant 0 : index
    %c0_4 = arith.constant 0 : index
    %c0_5 = arith.constant 0 : index
    %c0_6 = arith.constant 0 : index
    %2 = vector.load %arg3[%c0_3, %c0_4, %c0_5, %c0_6] : memref<1x1x9x8xf32, #tpu.memory_space<vmem>>, vector<1x1x9x8xf32>
    %3 = vector.shape_cast %2 : vector<1x1x9x8xf32> to vector<1x9x8xf32>
    %4 = vector.extract_strided_slice %1 {offsets = [0, 0, 0, 0], sizes = [8, 1, 9, 8], strides = [1, 1, 1, 1]} : vector<8x2x9x8xf32> to vector<8x1x9x8xf32>
    %5 = vector.shape_cast %4 : vector<8x1x9x8xf32> to vector<8x9x8xf32>
    %6 = vector.extract_strided_slice %1 {offsets = [0, 1, 0, 0], sizes = [8, 1, 9, 8], strides = [1, 1, 1, 1]} : vector<8x2x9x8xf32> to vector<8x1x9x8xf32>
    %7 = vector.shape_cast %6 : vector<8x1x9x8xf32> to vector<8x9x8xf32>
    %8 = vector.extract_strided_slice %1 {offsets = [1, 0, 0, 0], sizes = [7, 1, 9, 8], strides = [1, 1, 1, 1]} : vector<8x2x9x8xf32> to vector<7x1x9x8xf32>
    %9 = vector.shape_cast %8 : vector<7x1x9x8xf32> to vector<7x9x8xf32>
    %10 = tpu.concatenate %9, %3 in 0 : vector<7x9x8xf32>, vector<1x9x8xf32> -> vector<8x9x8xf32>
    %cst = arith.constant 0.000000e+00 : f32
    %11 = vector.broadcast %cst : f32 to vector<64x4xf32>
    %12 = vector.extract_strided_slice %5 {offsets = [0, 0, 0], sizes = [8, 8, 8], strides = [1, 1, 1]} : vector<8x9x8xf32> to vector<8x8x8xf32>
    %13 = vector.shape_cast %12 : vector<8x8x8xf32> to vector<64x8xf32>
    %c0_7 = arith.constant 0 : index
    %c0_8 = arith.constant 0 : index
    %c0_9 = arith.constant 0 : index
    %14 = vector.load %arg4[%c0_7, %c0_8, %c0_9] : memref<3x8x4xf32, #tpu.memory_space<vmem>>, vector<1x8x4xf32>
    %15 = vector.shape_cast %14 : vector<1x8x4xf32> to vector<8x4xf32>
    %cst_10 = arith.constant dense<0.000000e+00> : vector<64x4xf32>
    %16 = tpu.matmul %13, %15, %cst_10 {dimension_numbers = #tpu.dot_dimension_numbers<[1], [0], [0], [1], [0, 0, 1, 1], [], []>} : vector<64x8xf32>, vector<8x4xf32>, vector<64x4xf32> -> vector<64x4xf32>
    %17 = arith.addf %11, %16 : vector<64x4xf32>
    %18 = vector.extract_strided_slice %5 {offsets = [0, 1, 0], sizes = [8, 8, 4], strides = [1, 1, 1]} : vector<8x9x8xf32> to vector<8x8x4xf32>
    %19 = vector.shape_cast %18 : vector<8x8x4xf32> to vector<64x4xf32>
    %c0_11 = arith.constant 0 : index
    %c0_12 = arith.constant 0 : index
    %c0_13 = arith.constant 0 : index
    %20 = vector.load %arg5[%c0_11, %c0_12, %c0_13] : memref<3x4x4xf32, #tpu.memory_space<vmem>>, vector<1x4x4xf32>
    %21 = vector.shape_cast %20 : vector<1x4x4xf32> to vector<4x4xf32>
    %cst_14 = arith.constant dense<0.000000e+00> : vector<64x4xf32>
    %22 = tpu.matmul %19, %21, %cst_14 {dimension_numbers = #tpu.dot_dimension_numbers<[1], [0], [0], [1], [0, 0, 1, 1], [], []>} : vector<64x4xf32>, vector<4x4xf32>, vector<64x4xf32> -> vector<64x4xf32>
    %23 = arith.addf %17, %22 : vector<64x4xf32>
    %24 = vector.extract_strided_slice %7 {offsets = [0, 0, 0], sizes = [8, 8, 8], strides = [1, 1, 1]} : vector<8x9x8xf32> to vector<8x8x8xf32>
    %25 = vector.shape_cast %24 : vector<8x8x8xf32> to vector<64x8xf32>
    %c1 = arith.constant 1 : index
    %c0_15 = arith.constant 0 : index
    %c0_16 = arith.constant 0 : index
    %26 = vector.load %arg4[%c1, %c0_15, %c0_16] : memref<3x8x4xf32, #tpu.memory_space<vmem>>, vector<1x8x4xf32>
    %27 = vector.shape_cast %26 : vector<1x8x4xf32> to vector<8x4xf32>
    %cst_17 = arith.constant dense<0.000000e+00> : vector<64x4xf32>
    %28 = tpu.matmul %25, %27, %cst_17 {dimension_numbers = #tpu.dot_dimension_numbers<[1], [0], [0], [1], [0, 0, 1, 1], [], []>} : vector<64x8xf32>, vector<8x4xf32>, vector<64x4xf32> -> vector<64x4xf32>
    %29 = arith.addf %23, %28 : vector<64x4xf32>
    %30 = vector.extract_strided_slice %7 {offsets = [0, 1, 0], sizes = [8, 8, 4], strides = [1, 1, 1]} : vector<8x9x8xf32> to vector<8x8x4xf32>
    %31 = vector.shape_cast %30 : vector<8x8x4xf32> to vector<64x4xf32>
    %c1_18 = arith.constant 1 : index
    %c0_19 = arith.constant 0 : index
    %c0_20 = arith.constant 0 : index
    %32 = vector.load %arg5[%c1_18, %c0_19, %c0_20] : memref<3x4x4xf32, #tpu.memory_space<vmem>>, vector<1x4x4xf32>
    %33 = vector.shape_cast %32 : vector<1x4x4xf32> to vector<4x4xf32>
    %cst_21 = arith.constant dense<0.000000e+00> : vector<64x4xf32>
    %34 = tpu.matmul %31, %33, %cst_21 {dimension_numbers = #tpu.dot_dimension_numbers<[1], [0], [0], [1], [0, 0, 1, 1], [], []>} : vector<64x4xf32>, vector<4x4xf32>, vector<64x4xf32> -> vector<64x4xf32>
    %35 = arith.addf %29, %34 : vector<64x4xf32>
    %36 = vector.extract_strided_slice %10 {offsets = [0, 0, 0], sizes = [8, 8, 8], strides = [1, 1, 1]} : vector<8x9x8xf32> to vector<8x8x8xf32>
    %37 = vector.shape_cast %36 : vector<8x8x8xf32> to vector<64x8xf32>
    %c2 = arith.constant 2 : index
    %c0_22 = arith.constant 0 : index
    %c0_23 = arith.constant 0 : index
    %38 = vector.load %arg4[%c2, %c0_22, %c0_23] : memref<3x8x4xf32, #tpu.memory_space<vmem>>, vector<1x8x4xf32>
    %39 = vector.shape_cast %38 : vector<1x8x4xf32> to vector<8x4xf32>
    %cst_24 = arith.constant dense<0.000000e+00> : vector<64x4xf32>
    %40 = tpu.matmul %37, %39, %cst_24 {dimension_numbers = #tpu.dot_dimension_numbers<[1], [0], [0], [1], [0, 0, 1, 1], [], []>} : vector<64x8xf32>, vector<8x4xf32>, vector<64x4xf32> -> vector<64x4xf32>
    %41 = arith.addf %35, %40 : vector<64x4xf32>
    %42 = vector.extract_strided_slice %10 {offsets = [0, 1, 0], sizes = [8, 8, 4], strides = [1, 1, 1]} : vector<8x9x8xf32> to vector<8x8x4xf32>
    %43 = vector.shape_cast %42 : vector<8x8x4xf32> to vector<64x4xf32>
    %c2_25 = arith.constant 2 : index
    %c0_26 = arith.constant 0 : index
    %c0_27 = arith.constant 0 : index
    %44 = vector.load %arg5[%c2_25, %c0_26, %c0_27] : memref<3x4x4xf32, #tpu.memory_space<vmem>>, vector<1x4x4xf32>
    %45 = vector.shape_cast %44 : vector<1x4x4xf32> to vector<4x4xf32>
    %cst_28 = arith.constant dense<0.000000e+00> : vector<64x4xf32>
    %46 = tpu.matmul %43, %45, %cst_28 {dimension_numbers = #tpu.dot_dimension_numbers<[1], [0], [0], [1], [0, 0, 1, 1], [], []>} : vector<64x4xf32>, vector<4x4xf32>, vector<64x4xf32> -> vector<64x4xf32>
    %47 = arith.addf %41, %46 : vector<64x4xf32>
    %c0_29 = arith.constant 0 : index
    %c0_30 = arith.constant 0 : index
    %48 = vector.load %arg6[%c0_29, %c0_30] : memref<1x4xf32, #tpu.memory_space<vmem>>, vector<1x4xf32>
    %49 = vector.broadcast %48 : vector<1x4xf32> to vector<64x4xf32>
    %50 = arith.addf %47, %49 : vector<64x4xf32>
    %51 = vector.shape_cast %50 : vector<64x4xf32> to vector<1x8x8x4xf32>
    %c0_31 = arith.constant 0 : index
    %c0_32 = arith.constant 0 : index
    %c0_33 = arith.constant 0 : index
    %c0_34 = arith.constant 0 : index
    %52 = vector.load %arg7[%c0_31, %c0_32, %c0_33, %c0_34] : memref<1x8x8x4xf32, #tpu.memory_space<vmem>>, vector<1x8x8x4xf32>
    tpu.vector_store %arg7[%c0_31, %c0_32, %c0_33, %c0_34], %51 {strides = array<i32>} : memref<1x8x8x4xf32, #tpu.memory_space<vmem>>, vector<1x8x8x4xf32>,
    return
  }
  func.func @transform_0(%arg0: i32, %arg1: i32) -> (i32, i32, i32, i32) {
    %c0_i32 = arith.constant 0 : i32
    %c0_i32_0 = arith.constant 0 : i32
    %c0_i32_1 = arith.constant 0 : i32
    return %arg0, %arg1, %c0_i32, %c0_i32_0 : i32, i32, i32, i32
  }
  func.func @transform_1(%arg0: i32, %arg1: i32) -> (i32, i32, i32, i32) {
    %c1_i32 = arith.constant 1 : i32
    %0 = arith.addi %arg1, %c1_i32 : i32
    %c2_i32 = arith.constant 2 : i32
    %1 = arith.muli %0, %c2_i32 : i32
    %c8_i32 = arith.constant 8 : i32
    %2 = arith.muli %1, %c8_i32 : i32
    %c16_i32 = arith.constant 16 : i32
    %3 = arith.minsi %2, %c16_i32 : i32
    %c0_i32 = arith.constant 0 : i32
    %c0_i32_0 = arith.constant 0 : i32
    %c0_i32_1 = arith.constant 0 : i32
    return %arg0, %3, %c0_i32, %c0_i32_0 : i32, i32, i32, i32
  }
  func.func @transform_2(%arg0: i32, %arg1: i32) -> (i32, i32, i32) {
    %c0_i32 = arith.constant 0 : i32
    %c0_i32_0 = arith.constant 0 : i32
    %c0_i32_1 = arith.constant 0 : i32
    %c0_i32_2 = arith.constant 0 : i32
    return %c0_i32, %c0_i32_0, %c0_i32_1 : i32, i32, i32
  }
  func.func @transform_3(%arg0: i32, %arg1: i32) -> (i32, i32, i32) {
    %c0_i32 = arith.constant 0 : i32
    %c0_i32_0 = arith.constant 0 : i32
    %c0_i32_1 = arith.constant 0 : i32
    %c0_i32_2 = arith.constant 0 : i32
    return %c0_i32, %c0_i32_0, %c0_i32_1 : i32, i32, i32
  }
  func.func @transform_4(%arg0: i32, %arg1: i32) -> (i32, i32) {
    %c0_i32 = arith.constant 0 : i32
    %c0_i32_0 = arith.constant 0 : i32
    %c0_i32_1 = arith.constant 0 : i32
    return %c0_i32, %c0_i32_0 : i32, i32
  }
  func.func @transform_5(%arg0: i32, %arg1: i32) -> (i32, i32, i32, i32) {
    %c0_i32 = arith.constant 0 : i32
    %c0_i32_0 = arith.constant 0 : i32
    %c0_i32_1 = arith.constant 0 : i32
    return %arg0, %arg1, %c0_i32, %c0_i32_0 : i32, i32, i32, i32
  }
}

</mosaic_0001>

<bundles_post_ra>
// kernel: tpu_custom_call.1
= control target key start
LH: loop header
LB: loop body
LE: loop exit
PB: predicated region body
PF: predicated region fallthrough
CT: control target
= control target key end

     0   :  { %s1689_s18 = smov 0   ;;  %s1691_s19 = smov 0   ;;  %s1958_s0 = inlined_call_operand.vmem [shape: f32[2,17,9,8], index: 0, kind: input, shape index: {}]   ;;  %s1959_s1 = inlined_call_operand.vmem [shape: f32[2,17,9,8], index: 1, kind: input, shape index: {}]   ;;  %s1960_s2 = inlined_call_operand.vmem [shape: f32[3,8,4], index: 2, kind: input, shape index: {}]   ;;  %s1961_s3 = inlined_call_operand.vmem [shape: f32[3,4,4], index: 3, kind: input, shape index: {}]   ;;  %s1962_s4 = inlined_call_operand.vmem [shape: f32[1,4], index: 4, kind: input, shape index: {}]   ;;  %s1963_s5 = inlined_call_operand.vmem [shape: f32[2,8,8,4], index: 5, kind: output, shape index: {}]  }
   0x1   :  { %s1693_s20 = smov 0  }
   0x2 LB: > { %s27_s21 = sadd.s32 1, %s1653_s19  ;;  %p1364_p0 = scmp.ge.s32.totalorder %s1657_s20, 1  ;;  %s1657_s20 = sphi %s1693_s20, %s15_s20   ;;  %s1653_s19 = sphi %s1691_s19, %s1965_s19   ;;  %s1649_s18 = sphi %s1689_s18, %s1964_s18  }
   0x3   : > { %p29_p1 = scmp.ge.s32.totalorder %s27_s21, 2  ;;  %p251_p2 = scmp.lt.s32.totalorder %s1657_s20, 3 }
   0x5   : > { %s1967_s21 = smov (%p29_p1, %s27_s21), 0  ;;  %p252_p3 = pnand %p1364_p0, %p251_p2 }
   0x6   : > { %v430_v0 = vld [vmem:[%s1961_s3] sm:$0xf] (!%p252_p3)  ;;  %vm448_vm0 = vcmask (!%p252_p3), 1043456   ;;  %v1395_v1 = vld [vmem:[%s1961_s3 + $0x4] sm:$0xf] (!%p252_p3)  ;;  %p312_p4 = scmp.lt.s32.totalorder (!%p252_p3), %s1649_s18, 1 }
   0x7   : > { %255 = sbr.rel (%p252_p3) target bundleno = 287 (0x11f), region = 40  ;;  %1484 = vmatprep.subr.msk.mxu1 (!%p252_p3), %vm448_vm0, %v430_v0  ;;  %1526 = vmatprep.subr.msk.mxu0 (!%p252_p3), %vm448_vm0, %v1395_v1  ;;  %v388_v2 = vld [vmem:[%s1960_s2] sm:$0xff] (!%p252_p3)  ;;  %v1405_v3 = vld [vmem:[%s1960_s2 + $0x10] sm:$0xff] (!%p252_p3)  ;;  %vm405_vm1 = vcmask (!%p252_p3), 1046528   ;;  %vm431_vm2 = vcmask (!%p252_p3), 31744   ;;  %v1768_v28 = vld [vmem:[%s1960_s2 + $0x8] sm:$0xff] (!%p252_p3) }
   0x8   : > { %1485 = vmatpush3.msk.msra.mxu1 (!%p252_p3), %vm448_vm0, %v430_v0  ;;  %1527 = vmatpush3.msk.msra.mxu0 (!%p252_p3), %vm448_vm0, %v1395_v1  ;;  %v1785_v35 = vld [vmem:[%s1961_s3 + $0x8] sm:$0xf] (!%p252_p3)  ;;  %vm557_vm3 = vcmask (!%p252_p3), 64512  }
   0x9   : > { %1498 = vmatprep.subr.mxu1 (!%p252_p3), %v388_v2  ;;  %1540 = vmatprep.subr.mxu0 (!%p252_p3), %v1405_v3 }
   0xe   : > { %s1969_s18 = smov (!%p312_p4, %s1649_s18), 1 }
   0xf   : > { %s1608_s30 = smul.u32 272, %s1969_s18  ;;  %s1429_s17 = sshll.u32 %s1969_s18, 6 }
  0x10   : > { %s1931_s26 = scalar_lea.vmem %s1963_s5, %s1429_s17 }
  0x11   : > { %s1731_s8 = scalar_lea.vmem %s1958_s0, %s1608_s30  ;;  %s1428_s13 = sadd.s32 256, %s1608_s30 }
  0x12   : > { %v1734_v4 = vld [vmem:[%s1731_s8] sm:$0xff]  ;;  %v355_v5 = vld [vmem:[%s1731_s8 + $0x8] sm:$0x1]  ;;  %v1738_v6 = vld [vmem:[%s1731_s8 + $0x10] sm:$0xff]  ;;  %s339_s16 = scalar_lea.vmem %s1959_s1, %s1428_s13 }
  0x13   : > { %v406_v7 = vrot.slane %v1734_v4, 1  ;;  %v407_v8 = vrot.slane %v355_v5, 1  ;;  %v357_v9 = vld [vmem:[%s1731_s8 + $0x18] sm:$0x1]  ;;  %v826_v10 = vrot.slane %v1738_v6, 1  ;;  %v1744_v11 = vld [vmem:[%s1731_s8 + $0x20] sm:$0xff] }
  0x14   : > { %v827_v12 = vrot.slane %v357_v9, 1  ;;  %v359_v13 = vld [vmem:[%s1731_s8 + $0x28] sm:$0x1]  ;;  %v409_v14 = vrot.slane %v1744_v11, 1  ;;  %v1749_v15 = vld [vmem:[%s1731_s8 + $0x30] sm:$0xff]  ;;  %v1752_v16 = vld [vmem:[%s1731_s8 + $0x40] sm:$0xff] }
  0x15   : > { %v408_v17 = vsel %vm405_vm1, %v406_v7, %v407_v8  ;;  %v410_v18 = vrot.slane %v359_v13, 1  ;;  %v361_v19 = vld [vmem:[%s1731_s8 + $0x38] sm:$0x1]  ;;  %v829_v20 = vrot.slane %v1749_v15, 1  ;;  %v363_v21 = vld [vmem:[%s1731_s8 + $0x48] sm:$0x1] }
  0x16   : > { %1486 = vmatprep.mubr.msk.f32.mxu1 %vm431_vm2, %v408_v17  ;;  %v828_v22 = vsel %vm405_vm1, %v826_v10, %v827_v12  ;;  %v830_v23 = vrot.slane %v361_v19, 1  ;;  %v412_v24 = vrot.slane %v1752_v16, 1  ;;  %v413_v25 = vrot.slane %v363_v21, 1  ;;  %v1762_v26 = vld [vmem:[%s1731_s8 + $0x50] sm:$0xff]  ;;  %v365_v27 = vld [vmem:[%s1731_s8 + $0x58] sm:$0x1] }
  0x17   : > { %1528 = vmatprep.mubr.msk.f32.mxu0 %vm431_vm2, %v828_v22  ;;  %v1772_v29 = vsel %vm405_vm1, %v409_v14, %v410_v18  ;;  %v832_v30 = vrot.slane %v1762_v26, 1  ;;  %v833_v31 = vrot.slane %v365_v27, 1  ;;  %v1776_v32 = vld [vmem:[%s1731_s8 + $0x60] sm:$0xff]  ;;  %v367_v33 = vld [vmem:[%s1731_s8 + $0x68] sm:$0x1]  ;;  %v1780_v34 = vld [vmem:[%s1731_s8 + $0x70] sm:$0xff] }
  0x18   : > { %1487 = vmatmul.mubr.msk.f32.vlgmr.msra.gmra.mrb[0].mxu1 %vm431_vm2, %v1772_v29  ;;  %v831_v36 = vsel %vm405_vm1, %v829_v20, %v830_v23  ;;  %v1791_v37 = vsel %vm405_vm1, %v412_v24, %v413_v25  ;;  %v415_v38 = vrot.slane %v1776_v32, 1  ;;  %v416_v39 = vrot.slane %v367_v33, 1  ;;  %v369_v40 = vld [vmem:[%s1731_s8 + $0x78] sm:$0x1]  ;;  %v1796_v41 = vld [vmem:[%s1731_s8 + $0x80] sm:$0xff]  ;;  %v1799_v42 = vld [vmem:[%s1731_s8 + $0x90] sm:$0xff] }
  0x19   : > { %1499 = vmatpush3.msra.mxu1 %v388_v2  ;;  %1529 = vmatmul.mubr.msk.f32.vlgmr.msra.gmra.mrb[0].mxu0 %vm431_vm2, %v831_v36  ;;  %v834_v43 = vsel %vm405_vm1, %v832_v30, %v833_v31  ;;  %v835_v44 = vrot.slane %v1780_v34, 1  ;;  %v836_v45 = vrot.slane %v369_v40, 1  ;;  %v371_v46 = vld [vmem:[%s1731_s8 + $0x88] sm:$0x1]  ;;  %v418_v47 = vrot.slane %v1796_v41, 1  ;;  %v1807_v48 = vld [vmem:[%s1731_s8 + $0xa0] sm:$0xff] }
  0x1a   : > { %1541 = vmatpush3.msra.mxu0 %v1405_v3  ;;  %1489 = vmatprep.mubr.msk.f32.mxu1 %vm431_vm2, %v1791_v37  ;;  %v1812_v49 = vsel %vm405_vm1, %v415_v38, %v416_v39  ;;  %v419_v50 = vrot.slane %v371_v46, 1  ;;  %v373_v51 = vld [vmem:[%s1731_s8 + $0x98] sm:$0x1]  ;;  %v838_v52 = vrot.slane %v1799_v42, 1  ;;  %v375_v53 = vld [vmem:[%s1731_s8 + $0xa8] sm:$0x1] }
  0x1b   : > { %1531 = vmatprep.mubr.msk.f32.mxu0 %vm431_vm2, %v834_v43  ;;  %v837_v54 = vsel %vm405_vm1, %v835_v44, %v836_v45  ;;  %v839_v55 = vrot.slane %v373_v51, 1  ;;  %v421_v56 = vrot.slane %v1807_v48, 1  ;;  %v422_v57 = vrot.slane %v375_v53, 1  ;;  %v1821_v58 = vld [vmem:[%s1731_s8 + $0xb0] sm:$0xff]  ;;  %v377_v59 = vld [vmem:[%s1731_s8 + $0xb8] sm:$0x1]  ;;  %1512 = vmatprep.subr.mxu1 %v1768_v28 }
  0x1c   : > { %1490 = vmatmul.mubr.msk.f32.gmra.mrb[2].mxu1 %vm431_vm2, %v1812_v49  ;;  %v1828_v60 = vsel %vm405_vm1, %v418_v47, %v419_v50  ;;  %v841_v61 = vrot.slane %v1821_v58, 1  ;;  %v842_v62 = vrot.slane %v377_v59, 1  ;;  %v378_v63 = vld [vmem:[%s1731_s8 + $0xc0] sm:$0xff]  ;;  %v379_v0 = vld [vmem:[%s1731_s8 + $0xc8] sm:$0x1]  ;;  %v1834_v1 = vld [vmem:[%s1731_s8 + $0xd0] sm:$0xff]  ;;  %1554 = vmatprep.subr.msk.mxu0 %vm448_vm0, %v1785_v35 }
  0x1d   : > { %1532 = vmatmul.mubr.msk.f32.gmra.mrb[2].mxu0 %vm431_vm2, %v837_v54  ;;  %1492 = vmatprep.mubr.msk.f32.mxu1 %vm431_vm2, %v1828_v60  ;;  %v840_v2 = vsel %vm405_vm1, %v838_v52, %v839_v55  ;;  %v423_v3 = vsel %vm405_vm1, %v421_v56, %v422_v57  ;;  %v424_v5 = vrot.slane %v378_v63, 1  ;;  %v425_v7 = vrot.slane %v379_v0, 1  ;;  %v381_v8 = vld [vmem:[%s1731_s8 + $0xd8] sm:$0x1]  ;;  %v382_v9 = vld [vmem:[%s1731_s8 + $0xe0] sm:$0xff]  ;;  %v384_v10 = vld [vmem:[%s1731_s8 + $0xf0] sm:$0xff] }
  0x1e   : > { %1534 = vmatprep.mubr.msk.f32.mxu0 %vm431_vm2, %v840_v2  ;;  %v843_v12 = vsel %vm405_vm1, %v841_v61, %v842_v62  ;;  %v844_v13 = vrot.slane %v1834_v1, 1  ;;  %v845_v14 = vrot.slane %v381_v8, 1  ;;  %v383_v17 = vld [vmem:[%s1731_s8 + $0xe8] sm:$0x1]  ;;  %v427_v18 = vrot.slane %v382_v9, 1 }
  0x1f   : > { %v426_v19 = vsel %vm405_vm1, %v424_v5, %v425_v7  ;;  %v428_v20 = vrot.slane %v383_v17, 1  ;;  %v385_v21 = vld [vmem:[%s1731_s8 + $0xf8] sm:$0x1]  ;;  %v847_v22 = vrot.slane %v384_v10, 1 }
  0x20   : > { %1493 = vmatmul.mubr.msk.f32.gmra.mrb[4].mxu1 %vm431_vm2, %v423_v3  ;;  %v846_v23 = vsel %vm405_vm1, %v844_v13, %v845_v14  ;;  %v848_v24 = vrot.slane %v385_v21, 1 }
  0x21   : > { %1535 = vmatmul.mubr.msk.f32.gmra.mrb[4].mxu0 %vm431_vm2, %v843_v12  ;;  %1495 = vmatprep.mubr.msk.f32.mxu1 %vm431_vm2, %v426_v19  ;;  %v429_v25 = vsel %vm405_vm1, %v427_v18, %v428_v20 }
  0x22   : > { %1537 = vmatprep.mubr.msk.f32.mxu0 %vm431_vm2, %v846_v23  ;;  %v849_v27 = vsel %vm405_vm1, %v847_v22, %v848_v24 }
  0x24   : > { %1496 = vmatmul.mubr.msk.f32.gmra.mrb[6].mxu1 %vm431_vm2, %v429_v25 }
  0x25   : > { %1538 = vmatmul.mubr.msk.f32.gmra.mrb[6].mxu0 %vm431_vm2, %v849_v27  ;;  %1500 = vmatprep.mubr.msk.f32.mxu1 %vm557_vm3, %v1734_v4  ;;  %v386_v4 = vld [vmem:[%s339_s16] sm:$0xff] }
  0x26   : > { %1542 = vmatprep.mubr.msk.f32.mxu0 %vm557_vm3, %v1744_v11 }
  0x28   : > { %1501 = vmatmul.mubr.msk.f32.vlgmr.msra.gmra.mrb[0].mxu1 %vm557_vm3, %v1744_v11  ;;  %v387_v11 = vld [vmem:[%s339_s16 + $0x8] sm:$0x1] }
  0x29   : > { %1513 = vmatpush3.msra.mxu1 %v1768_v28  ;;  %1543 = vmatmul.mubr.msk.f32.vlgmr.msra.gmra.mrb[0].mxu0 %vm557_vm3, %v1752_v16 }
  0x2a   : > { %1555 = vmatpush3.msk.msra.mxu0 %vm448_vm0, %v1785_v35  ;;  %1503 = vmatprep.mubr.msk.f32.mxu1 %vm557_vm3, %v1752_v16 }
  0x2b   : > { %1545 = vmatprep.mubr.msk.f32.mxu0 %vm557_vm3, %v1776_v32 }
  0x2c   : > { %1504 = vmatmul.mubr.msk.f32.gmra.mrb[2].mxu1 %vm557_vm3, %v1776_v32 }
  0x2d   : > { %1546 = vmatmul.mubr.msk.f32.gmra.mrb[2].mxu0 %vm557_vm3, %v1796_v41  ;;  %1506 = vmatprep.mubr.msk.f32.mxu1 %vm557_vm3, %v1796_v41 }
  0x2e   : > { %1548 = vmatprep.mubr.msk.f32.mxu0 %vm557_vm3, %v1807_v48 }
  0x30   : > { %1507 = vmatmul.mubr.msk.f32.gmra.mrb[4].mxu1 %vm557_vm3, %v1807_v48 }
  0x31   : > { %1549 = vmatmul.mubr.msk.f32.gmra.mrb[4].mxu0 %vm557_vm3, %v378_v63  ;;  %1509 = vmatprep.mubr.msk.f32.mxu1 %vm557_vm3, %v378_v63 }
  0x32   : > { %1551 = vmatprep.mubr.msk.f32.mxu0 %vm557_vm3, %v382_v9 }
  0x34   : > { %1510 = vmatmul.mubr.msk.f32.gmra.mrb[6].mxu1 %vm557_vm3, %v382_v9 }
  0x35   : > { %1552 = vmatmul.mubr.msk.f32.gmra.mrb[6].mxu0 %vm557_vm3, %v386_v4  ;;  %1514 = vmatprep.mubr.msk.f32.mxu1 %vm557_vm3, %v1738_v6  ;;  %v1103_v6 = vrot.slane %v386_v4, 1 }
  0x36   : > { %1556 = vmatprep.mubr.msk.f32.mxu0 %vm431_vm2, %v1772_v29  ;;  %v1424_v29 = vld [vmem:[%s1962_s4] ss:$0 sm:$0xff] }
  0x38   : > { %1515 = vmatmul.mubr.msk.f32.vlgmr.msra.gmra.mrb[0].mxu1 %vm557_vm3, %v1749_v15  ;;  %v1104_v15 = vrot.slane %v387_v11, 1 }
  0x39   : > { %1557 = vmatmul.mubr.msk.f32.vlgmr.msra.gmra.mrb[0].mxu0 %vm431_vm2, %v1791_v37  ;;  %1517 = vmatprep.mubr.msk.f32.mxu1 %vm557_vm3, %v1762_v26 }
  0x3a   : > { %1559 = vmatprep.mubr.msk.f32.mxu0 %vm431_vm2, %v1812_v49  ;;  %v1105_v16 = vsel %vm405_vm1, %v1103_v6, %v1104_v15 }
  0x3c   : > { %1518 = vmatmul.mubr.msk.f32.gmra.mrb[2].mxu1 %vm557_vm3, %v1780_v34 }
  0x3d   : > { %1560 = vmatmul.mubr.msk.f32.gmra.mrb[2].mxu0 %vm431_vm2, %v1828_v60  ;;  %1520 = vmatprep.mubr.msk.f32.mxu1 %vm557_vm3, %v1799_v42 }
  0x3e   : > { %1562 = vmatprep.mubr.msk.f32.mxu0 %vm431_vm2, %v423_v3 }
  0x40   : > { %1521 = vmatmul.mubr.msk.f32.gmra.mrb[4].mxu1 %vm557_vm3, %v1821_v58 }
  0x41   : > { %1563 = vmatmul.mubr.msk.f32.gmra.mrb[4].mxu0 %vm431_vm2, %v426_v19  ;;  %1523 = vmatprep.mubr.msk.f32.mxu1 %vm557_vm3, %v1834_v1 }
  0x42   : > { %1565 = vmatprep.mubr.msk.f32.mxu0 %vm431_vm2, %v429_v25 }
  0x44   : > { %1524 = vmatmul.mubr.msk.f32.gmra.mrb[6].mxu1 %vm557_vm3, %v384_v10 }
  0x45   : > { %1566 = vmatmul.mubr.msk.f32.gmra.mrb[6].mxu0 %vm431_vm2, %v1105_v16 }
 0x10b   : > { %v1516_v26 = vpop.f32.mrb[0].mxu1 }
 0x10c   : > { %v1558_v28 = vpop.f32.mrb[0].mxu0  ;;  %v771_v30 = vpop.f32.mrb[1].mxu1 }
 0x10d   : > { %v1568_v31 = vadd.f32 %v1558_v28, %v1516_v26  ;;  %v1179_v32 = vpop.f32.mrb[1].mxu0 }
 0x10e   : > { %v1569_v33 = vadd.f32 %v1179_v32, %v771_v30 }
 0x10f   : > { %v1234_v34 = vadd.f32 %v1568_v31, %v1424_v29  ;;  %v1519_v35 = vpop.f32.mrb[2].mxu1 }
 0x110   : > { %v1233_v36 = vadd.f32 %v1569_v33, %v1424_v29  ;;  %v1561_v37 = vpop.f32.mrb[2].mxu0  ;;  %v781_v38 = vpop.f32.mrb[3].mxu1 }
 0x111   : > { %1242 = vst.msk [vmem:[%s1931_s26 + $0x8] sm:$0xff] %vm431_vm2, %v1234_v34  ;;  %v1570_v39 = vadd.f32 %v1561_v37, %v1519_v35  ;;  %v1189_v40 = vpop.f32.mrb[3].mxu0 }
 0x112   : > { %1241 = vst.msk [vmem:[%s1931_s26] sm:$0xff] %vm431_vm2, %v1233_v36  ;;  %v1571_v41 = vadd.f32 %v1189_v40, %v781_v38 }
 0x113   : > { %v1236_v42 = vadd.f32 %v1570_v39, %v1424_v29  ;;  %v1522_v43 = vpop.f32.mrb[4].mxu1 }
 0x114   : > { %v1235_v44 = vadd.f32 %v1571_v41, %v1424_v29  ;;  %v1564_v45 = vpop.f32.mrb[4].mxu0  ;;  %v791_v46 = vpop.f32.mrb[5].mxu1 }
 0x115   : > { %1244 = vst.msk [vmem:[%s1931_s26 + $0x18] sm:$0xff] %vm431_vm2, %v1236_v42  ;;  %v1572_v47 = vadd.f32 %v1564_v45, %v1522_v43  ;;  %v1199_v48 = vpop.f32.mrb[5].mxu0 }
 0x116   : > { %1243 = vst.msk [vmem:[%s1931_s26 + $0x10] sm:$0xff] %vm431_vm2, %v1235_v44  ;;  %v1573_v49 = vadd.f32 %v1199_v48, %v791_v46 }
 0x117   : > { %v1238_v50 = vadd.f32 %v1572_v47, %v1424_v29  ;;  %v1525_v51 = vpop.f32.mrb[6].mxu1 }
 0x118   : > { %v1237_v52 = vadd.f32 %v1573_v49, %v1424_v29  ;;  %v1567_v53 = vpop.f32.mrb[6].mxu0  ;;  %v801_v54 = vpop.f32.mrb[7].mxu1 }
 0x119   : > { %1246 = vst.msk [vmem:[%s1931_s26 + $0x28] sm:$0xff] %vm431_vm2, %v1238_v50  ;;  %v1574_v55 = vadd.f32 %v1567_v53, %v1525_v51  ;;  %v1209_v56 = vpop.f32.mrb[7].mxu0 }
 0x11a   : > { %1245 = vst.msk [vmem:[%s1931_s26 + $0x20] sm:$0xff] %vm431_vm2, %v1237_v52  ;;  %v1575_v57 = vadd.f32 %v1209_v56, %v801_v54 }
 0x11b   : > { %v1240_v58 = vadd.f32 %v1574_v55, %v1424_v29 }
 0x11c   : > { %v1239_v59 = vadd.f32 %v1575_v57, %v1424_v29 }
 0x11d   : > { %1248 = vst.msk [vmem:[%s1931_s26 + $0x38] sm:$0xff] %vm431_vm2, %v1240_v58 }
 0x11e   : > { %1247 = vst.msk [vmem:[%s1931_s26 + $0x30] sm:$0xff] %vm431_vm2, %v1239_v59 }
 0x11f PF: > { %s15_s20 = sadd.s32 1, %s1657_s20   ;;  %s1964_s18 = smov %s1653_s19 }
 0x120   : > { %p12_p5 = scmp.ge.s32.totalorder %s15_s20, 4   ;;  %s1965_s19 = smov %s1967_s21 }
 0x122   :  { %14 = sbr.rel (!%p12_p5) target bundleno = 2 (0x2), region = 77 }

</bundles_post_ra>
